<compile_context>
chip_gen: v5e
topology: v5e:2x2
jax: 0.10.0
libtpu: 0.0.40
codegen_flags: <defaults>
</compile_context>

<pallas_src>
import functools

import jax
import jax.numpy as jnp
from jax import lax
from jax.experimental import pallas as pl
from jax.experimental.pallas import tpu as pltpu


# ----------------------------------------------------------------------------
# Generic tiled matmul: x[M,K] @ wt[K,N] (weights pre-transposed), bf16 in, fp32 acc
# ----------------------------------------------------------------------------

def _matmul_kernel(x_ref, w_ref, o_ref, acc_ref):
    @pl.when(pl.program_id(2) == 0)
    def _init():
        acc_ref[...] = jnp.zeros_like(acc_ref)

    acc_ref[...] += jnp.dot(x_ref[...], w_ref[...],
                            preferred_element_type=jnp.float32)

    @pl.when(pl.program_id(2) == pl.num_programs(2) - 1)
    def _store():
        o_ref[...] = acc_ref[...].astype(o_ref.dtype)


def _tile(n, prefs=(512, 256, 128)):
    # Largest preferred tile that divides n; otherwise the full dimension
    # (full-dim blocks are exempt from the (8,128) divisibility rule).
    for p in prefs:
        if n >= p and n % p == 0:
            return p
    return n


def pallas_matmul(x, wt, out_dtype=jnp.bfloat16):
    M, K = x.shape
    K2, N = wt.shape
    assert K == K2
    tm, tn, tk = _tile(M), _tile(N), _tile(K)
    return pl.pallas_call(
        _matmul_kernel,
        out_shape=jax.ShapeDtypeStruct((M, N), out_dtype),
        grid=(M // tm, N // tn, K // tk),
        in_specs=[pl.BlockSpec((tm, tk), lambda i, j, k: (i, k)),
                  pl.BlockSpec((tk, tn), lambda i, j, k: (k, j))],
        out_specs=pl.BlockSpec((tm, tn), lambda i, j, k: (i, j)),
        scratch_shapes=[pltpu.VMEM((tm, tn), jnp.float32)],
        compiler_params=pltpu.CompilerParams(
            dimension_semantics=("parallel", "parallel", "arbitrary")),
    )(x, wt)


# ----------------------------------------------------------------------------
# Fused relative attention kernel:
#   AC + BD score matmuls, in-VMEM rel_shift (pltpu.roll barrel shifter with hoisted
#   predicates), in-kernel causal mask (or explicit additive mask), softmax, @V.
# ----------------------------------------------------------------------------

def _rel_attn_body(q_ref, k_ref, v_ref, rk_ref, rw_ref, rr_ref, mask_ref, o_ref,
                   *, qlen, n_head, d_head, scale, causal):
    tq = q_ref.shape[0]
    klen = k_ref.shape[0]
    qi = pl.program_id(1)

    qt = q_ref[...]                                  # [tq, H*Dh] bf16
    kt = k_ref[...]                                  # [K , H*Dh] bf16
    vt = v_ref[...]                                  # [K , H*Dh] bf16
    rkt = rk_ref[...]                                # [K , H*Dh] bf16
    # Bias adds hoisted out of the head loop: one [tq, H*Dh] add per term per tile
    # instead of per-head [tq, Dh] adds + per-head broadcasts.
    q_ac = qt + rw_ref[...]                          # q + r_w_bias
    q_bd = qt + rr_ref[...]                          # q + r_r_bias

    # ---- index machinery for rel_shift / masking, hoisted (shared by all heads) ----
    local = lax.broadcasted_iota(jnp.int32, (tq, 1), 0)
    grow = local + qi * tq                           # global query row
    cols = lax.broadcasted_iota(jnp.int32, (tq, klen), 1)
    boundary = (klen - qlen) + grow                  # last valid relative column
    amt = grow + (klen - qlen + 1)                   # per-row right-roll amount
    amt = jnp.where(amt >= klen, amt - klen, amt)
    nbits = max(1, (klen - 1).bit_length())
    # Pre-broadcast the barrel-shifter predicates once (JAX does not CSE broadcasts).
    bit_masks = tuple(jnp.broadcast_to((amt & (1 << b)) != 0, (tq, klen))
                      for b in range(nbits))
    beyond = cols > boundary                         # region the causal mask hides

    if causal:
        mask_add = None
        at_spill0 = None
    else:
        mask_add = mask_ref[...].astype(jnp.float32)
        at_spill0 = cols == boundary + 1

    def rel_shift(y):
        # Row-variable circular right-roll via log2(K) XLU lane rotations + selects.
        for b in range(nbits):
            y = jnp.where(bit_masks[b], pltpu.roll(y, 1 << b, axis=1), y)
        if causal:
            # The only incorrect entries after the roll sit at cols > boundary, and
            # the causal mask forces exactly those to -1e30 below -> leave untouched.
            return y
        # Explicit-mask path: reproduce the torch view-trick spill/zero pattern.
        # TODO(synk): spill is only exact within a q tile; exact cross-tile spill
        # (needed for arbitrary non-causal masks with multiple q tiles) not wired.
        spill = pltpu.roll(y, tq - 1, axis=0)        # row i <- row i+1 (wrap)
        return jnp.where(beyond,
                         jnp.where(at_spill0, jnp.float32(0.0), spill),
                         y)

    neg = jnp.float32(-1e30)
    for h in range(n_head):                          # static head loop
        sl = slice(h * d_head, (h + 1) * d_head)
        ac = lax.dot_general(q_ac[:, sl], kt[:, sl],
                             dimension_numbers=(((1,), (1,)), ((), ())),
                             preferred_element_type=jnp.float32)      # [tq, K]
        bd_raw = lax.dot_general(q_bd[:, sl], rkt[:, sl],
                                 dimension_numbers=(((1,), (1,)), ((), ())),
                                 preferred_element_type=jnp.float32)  # [tq, K]
        score = (ac + rel_shift(bd_raw)) * jnp.float32(scale)
        if causal:
            score = jnp.where(beyond, neg, score)
        else:
            score = score + mask_add
        m = jnp.max(score, axis=-1, keepdims=True)
        p = jnp.exp(score - m)
        denom = jnp.sum(p, axis=-1, keepdims=True)
        prob = (p * pl.reciprocal(denom, approx=True)).astype(vt.dtype)  # EUP slot
        out_h = jnp.dot(prob, vt[:, sl], preferred_element_type=jnp.float32)
        # Immediate per-head store bounds this head's live range (no cross-head
        # [tq,K] fp32 temporaries kept alive, no final concat). Final HBM writeback
        # of the whole [tq, H*Dh] block stays lane-dense.
        o_ref[:, sl] = out_h.astype(o_ref.dtype)


def _rel_attn_kernel_causal(q_ref, k_ref, v_ref, rk_ref, rw_ref, rr_ref, o_ref, *,
                            qlen, n_head, d_head, scale):
    _rel_attn_body(q_ref, k_ref, v_ref, rk_ref, rw_ref, rr_ref, None, o_ref,
                   qlen=qlen, n_head=n_head, d_head=d_head, scale=scale,
                   causal=True)


def _rel_attn_kernel_masked(q_ref, k_ref, v_ref, rk_ref, rw_ref, rr_ref, mask_ref,
                            o_ref, *, qlen, n_head, d_head, scale):
    _rel_attn_body(q_ref, k_ref, v_ref, rk_ref, rw_ref, rr_ref, mask_ref, o_ref,
                   qlen=qlen, n_head=n_head, d_head=d_head, scale=scale,
                   causal=False)


def pallas_rel_attention(qkv, rk, rw_flat, rr_flat, mask_bias, *,
                         n_head, d_head, scale, causal):
    B, Q, HD3 = qkv.shape
    HD = n_head * d_head
    assert HD3 == 3 * HD
    K = Q                                            # klen == qlen (no mems)
    tq = 128 if (Q >= 128 and Q % 128 == 0) else Q

    # q/k/v are read straight out of the packed QKV tensor via column-block specs.
    qkv_q = pl.BlockSpec((None, tq, HD), lambda b, i: (b, i, 0))
    qkv_k = pl.BlockSpec((None, K, HD), lambda b, i: (b, 0, 1))
    qkv_v = pl.BlockSpec((None, K, HD), lambda b, i: (b, 0, 2))
    rk_spec = pl.BlockSpec((K, HD), lambda b, i: (0, 0))
    bias_spec = pl.BlockSpec((1, HD), lambda b, i: (0, 0))
    out_spec = pl.BlockSpec((None, tq, HD), lambda b, i: (b, i, 0))

    kw = dict(qlen=Q, n_head=n_head, d_head=d_head, scale=scale)
    if causal:
        kernel = functools.partial(_rel_attn_kernel_causal, **kw)
        in_specs = [qkv_q, qkv_k, qkv_v, rk_spec, bias_spec, bias_spec]
        args = (qkv, qkv, qkv, rk, rw_flat, rr_flat)
    else:
        kernel = functools.partial(_rel_attn_kernel_masked, **kw)
        mask_spec = pl.BlockSpec((tq, K), lambda b, i: (i, 0))
        in_specs = [qkv_q, qkv_k, qkv_v, rk_spec, bias_spec, bias_spec, mask_spec]
        args = (qkv, qkv, qkv, rk, rw_flat, rr_flat, mask_bias)

    return pl.pallas_call(
        kernel,
        out_shape=jax.ShapeDtypeStruct((B, Q, HD), jnp.bfloat16),
        grid=(B, Q // tq),
        in_specs=in_specs,
        out_specs=out_spec,
        compiler_params=pltpu.CompilerParams(
            dimension_semantics=("parallel", "parallel"),
            # Explicit scoped-VMEM budget; stays under the 64 MiB v7x ceiling.
            vmem_limit_bytes=48 * 1024 * 1024),
    )(*args)


# ----------------------------------------------------------------------------
# Fused o_net matmul + residual add + LayerNorm epilogue
# ----------------------------------------------------------------------------

def _onet_ln_kernel(x_ref, w_ref, res_ref, g_ref, b_ref, o_ref, acc_ref, *,
                    eps, apply_ln):
    kk = pl.program_id(1)

    @pl.when(kk == 0)
    def _init():
        acc_ref[...] = jnp.zeros_like(acc_ref)

    acc_ref[...] += jnp.dot(x_ref[...], w_ref[...],
                            preferred_element_type=jnp.float32)

    @pl.when(kk == pl.num_programs(1) - 1)
    def _fin():
        h = acc_ref[...] + res_ref[...].astype(jnp.float32)
        if apply_ln:
            mu = jnp.mean(h, axis=-1, keepdims=True)
            var = jnp.mean(jnp.square(h - mu), axis=-1, keepdims=True)
            h = (h - mu) * lax.rsqrt(var + eps) * g_ref[...] + b_ref[...]
        o_ref[...] = h.astype(o_ref.dtype)


def pallas_onet_residual_ln(x, wo_t, residual, gamma, beta, *, apply_ln, eps=1e-5):
    M, HD = x.shape
    _, Dm = wo_t.shape
    tm, tk = _tile(M), _tile(HD)
    kernel = functools.partial(_onet_ln_kernel, eps=eps, apply_ln=apply_ln)
    return pl.pallas_call(
        kernel,
        out_shape=jax.ShapeDtypeStruct((M, Dm), jnp.float32),
        grid=(M // tm, HD // tk),
        in_specs=[
            pl.BlockSpec((tm, tk), lambda i, k: (i, k)),    # attn_vec tile
            pl.BlockSpec((tk, Dm), lambda i, k: (k, 0)),    # W_o^T tile
            pl.BlockSpec((tm, Dm), lambda i, k: (i, 0)),    # residual (w)
            pl.BlockSpec((1, Dm), lambda i, k: (0, 0)),     # gamma
            pl.BlockSpec((1, Dm), lambda i, k: (0, 0)),     # beta
        ],
        out_specs=pl.BlockSpec((tm, Dm), lambda i, k: (i, 0)),
        scratch_shapes=[pltpu.VMEM((tm, Dm), jnp.float32)],
        compiler_params=pltpu.CompilerParams(
            dimension_semantics=("parallel", "arbitrary")),
    )(x, wo_t, residual, gamma, beta)


# ----------------------------------------------------------------------------
# Standalone LayerNorm (only used on the pre_lnorm path)
# ----------------------------------------------------------------------------

def _ln_kernel(x_ref, g_ref, b_ref, o_ref, *, eps):
    x = x_ref[...].astype(jnp.float32)
    mu = jnp.mean(x, axis=-1, keepdims=True)
    var = jnp.mean(jnp.square(x - mu), axis=-1, keepdims=True)
    o_ref[...] = ((x - mu) * lax.rsqrt(var + eps) * g_ref[...]
                  + b_ref[...]).astype(o_ref.dtype)


def pallas_layernorm(x, gamma, beta, eps=1e-5):
    # TODO(synk): fuse pre-LN into the QKV matmul prologue instead of a separate pass.
    M, D = x.shape
    tm = _tile(M)
    kernel = functools.partial(_ln_kernel, eps=eps)
    return pl.pallas_call(
        kernel,
        out_shape=jax.ShapeDtypeStruct((M, D), jnp.float32),
        grid=(M // tm,),
        in_specs=[pl.BlockSpec((tm, D), lambda i: (i, 0)),
                  pl.BlockSpec((1, D), lambda i: (0, 0)),
                  pl.BlockSpec((1, D), lambda i: (0, 0))],
        out_specs=pl.BlockSpec((tm, D), lambda i: (i, 0)),
        compiler_params=pltpu.CompilerParams(dimension_semantics=("parallel",)),
    )(x, gamma, beta)


# ----------------------------------------------------------------------------
# Forward pass
# ----------------------------------------------------------------------------

def rel_multihead_attn_forward(params, w, r, attn_mask=None, mems=None, *,
                               n_head, d_head, pre_lnorm=False, causal=False):
    # TODO(synk): mems (recurrence memory) concatenation not wired; klen == qlen.
    if mems is not None:
        raise NotImplementedError("mems not supported in this kernel demo")
    B, Q, Dm = w.shape
    HD = n_head * d_head
    K = Q
    R = r.shape[0]
    assert R == K, "relative embeddings must cover klen"
    scale = 1.0 / (d_head ** 0.5)

    # One-time weight prep: pre-transpose so kernels compute x @ W^T; cast to bf16.
    W_qkv_t = params['W_qkv'].T.astype(jnp.bfloat16)   # [Dm, 3*HD] (fused QKV)
    W_r_t = params['W_r'].T.astype(jnp.bfloat16)       # [Dm, HD]
    W_o_t = params['W_o'].T.astype(jnp.bfloat16)       # [HD, Dm]
    rw_flat = params['r_w_bias'].reshape(1, HD).astype(jnp.bfloat16)
    rr_flat = params['r_r_bias'].reshape(1, HD).astype(jnp.bfloat16)
    gamma = params['gamma'].reshape(1, Dm).astype(jnp.float32)
    beta = params['beta'].reshape(1, Dm).astype(jnp.float32)

    if pre_lnorm:
        w_in = pallas_layernorm(w.reshape(B * Q, Dm), gamma, beta)
    else:
        w_in = w.reshape(B * Q, Dm)
    x = w_in.astype(jnp.bfloat16)

    # Single fused QKV projection (x read from HBM once); heads stay lane-packed.
    qkv = pallas_matmul(x, W_qkv_t).reshape(B, Q, 3 * HD)
    rk = pallas_matmul(r.astype(jnp.bfloat16), W_r_t)   # [K, HD]

    if causal:
        # Standard causal mask is generated inside the kernel from iotas
        # (equivalent to attn_mask = triu(ones, 1 + klen - qlen)); any attn_mask
        # argument is ignored on this path.
        mask_bias = None
    elif attn_mask is None:
        # TODO(synk): without a causal mask, the cross-tile rel_shift spill is only
        # exact within a single q tile.
        mask_bias = jnp.zeros((Q, K), jnp.float32)
    else:
        # fp32 to preserve arbitrary user-supplied masks exactly.
        mask_bias = jnp.where(attn_mask > 0, -1e30, 0.0).astype(jnp.float32)

    attn_vec = pallas_rel_attention(qkv, rk, rw_flat, rr_flat, mask_bias,
                                    n_head=n_head, d_head=d_head, scale=scale,
                                    causal=causal)

    out = pallas_onet_residual_ln(attn_vec.reshape(B * Q, HD), W_o_t,
                                  w.reshape(B * Q, Dm), gamma, beta,
                                  apply_ln=not pre_lnorm)
    return out.reshape(B, Q, Dm)


# ----------------------------------------------------------------------------
# Pure-JAX fp32 reference (exact torch-style _rel_shift) for correctness check
# ----------------------------------------------------------------------------

def rel_shift_ref(x):
    B, H, Q, K = x.shape
    zero_pad = jnp.zeros((B, H, Q, 1), x.dtype)
    x_padded = jnp.concatenate([zero_pad, x], axis=3)
    x_padded = x_padded.reshape(B, H, K + 1, Q)
    return x_padded[:, :, 1:, :].reshape(B, H, Q, K)


def reference_forward(params, w, r, attn_mask, n_head, d_head, pre_lnorm=False):
    B, Q, Dm = w.shape
    R = r.shape[0]
    scale = 1.0 / (d_head ** 0.5)

    def ln(x):
        mu = jnp.mean(x, -1, keepdims=True)
        var = jnp.mean(jnp.square(x - mu), -1, keepdims=True)
        return (x - mu) / jnp.sqrt(var + 1e-5) * params['gamma'] + params['beta']

    w_in = ln(w) if pre_lnorm else w
    heads = (w_in @ params['W_qkv'].T).reshape(B, Q, 3, n_head, d_head)
    q = heads[:, :, 0].transpose(0, 2, 1, 3)
    k = heads[:, :, 1].transpose(0, 2, 1, 3)
    v = heads[:, :, 2].transpose(0, 2, 1, 3)
    r_k = (r @ params['W_r'].T).reshape(R, n_head, d_head).transpose(1, 0, 2)

    ac = jnp.einsum('bhqd,bhkd->bhqk', q + params['r_w_bias'][None, :, None, :], k)
    bd = jnp.einsum('bhqd,hkd->bhqk', q + params['r_r_bias'][None, :, None, :], r_k)
    bd = rel_shift_ref(bd)
    score = (ac + bd) * scale
    if attn_mask is not None:
        score = jnp.where(attn_mask[None, None] > 0, -1e30, score)
    prob = jax.nn.softmax(score, axis=-1)
    av = jnp.einsum('bhqk,bhkd->bhqd', prob, v)
    av = av.transpose(0, 2, 1, 3).reshape(B, Q, n_head * d_head)
    out = av @ params['W_o'].T
    if pre_lnorm:
        return w + out
    return ln(w + out)


# ----------------------------------------------------------------------------
# Demo
# ----------------------------------------------------------------------------

if __name__ == "__main__":
    n_head, d_head, d_model = 4, 32, 128    # H*Dh = 128 -> lane-dense head packing
    bsz, qlen = 2, 256
    klen = qlen  # no mems

    key = jax.random.PRNGKey(0)
    k_w, k_r, k_qkv, k_rnet, k_o, k_rw, k_rr = jax.random.split(key, 7)

    params = dict(
        W_qkv=0.05 * jax.random.normal(k_qkv, (3 * n_head * d_head, d_model), jnp.float32),
        W_r=0.05 * jax.random.normal(k_rnet, (n_head * d_head, d_model), jnp.float32),
        W_o=0.05 * jax.random.normal(k_o, (d_model, n_head * d_head), jnp.float32),
        r_w_bias=0.05 * jax.random.normal(k_rw, (n_head, d_head), jnp.float32),
        r_r_bias=0.05 * jax.random.normal(k_rr, (n_head, d_head), jnp.float32),
        gamma=jnp.ones((d_model,), jnp.float32),
        beta=jnp.zeros((d_model,), jnp.float32),
    )

    w = jax.random.normal(k_w, (bsz, qlen, d_model), jnp.float32)
    r = jax.random.normal(k_r, (klen, d_model), jnp.float32)

    # Pallas path: standard causal masking generated in-kernel.
    out = rel_multihead_attn_forward(params, w, r, attn_mask=None, mems=None,
                                     n_head=n_head, d_head=d_head,
                                     pre_lnorm=False, causal=True)
    out = jax.block_until_ready(out)

    # Reference path: explicit causal mask (1 = masked), exact torch _rel_shift.
    attn_mask = jnp.triu(jnp.ones((qlen, klen), jnp.float32), k=1)
    ref = reference_forward(params, w, r, attn_mask, n_head, d_head, pre_lnorm=False)

    assert out.shape == (bsz, qlen, d_model)
    err = float(jnp.max(jnp.abs(out - ref)))
    # bf16 MXU inputs (fp32 accumulation) -> relaxed tolerance vs. the fp32 reference.
    assert jnp.allclose(out, ref, atol=5e-2, rtol=5e-2), f"max abs err {err}"

    print("KERNEL_OK")
</pallas_src>

<mosaic_0001>
module attributes {stable_mosaic.version = 11 : i64} {
  func.func @_matmul_kernel(%arg0: i32, %arg1: i32, %arg2: i32, %arg3: memref<512x128xbf16, #tpu.memory_space<vmem>>, %arg4: memref<128x128xbf16, #tpu.memory_space<vmem>>, %arg5: memref<512x128xbf16, #tpu.memory_space<vmem>>, %arg6: memref<512x128xf32, #tpu.memory_space<vmem>>) attributes {dimension_semantics = [#tpu.dimension_semantics<parallel>, #tpu.dimension_semantics<parallel>, #tpu.dimension_semantics<arbitrary>], iteration_bounds = array<i64: 1, 3, 1>, scalar_prefetch = 0 : i64, scratch_operands = 1 : i64, tpu.core_type = #tpu.core_type<tc>, window_params = [{transform_indices = @transform_0, window_bounds = array<i64: 512, 128>}, {transform_indices = @transform_1, window_bounds = array<i64: 128, 128>}, {transform_indices = @transform_2, window_bounds = array<i64: 512, 128>}]} {
    %c0_i32 = arith.constant 0 : i32
    %0 = arith.cmpi eq, %arg2, %c0_i32 : i32
    %1 = arith.extui %0 : i1 to i32
    %c0_i32_0 = arith.constant 0 : i32
    %2 = arith.cmpi ne, %1, %c0_i32_0 : i32
    scf.if %2 {
      %cst_10 = arith.constant 0.000000e+00 : f32
      %12 = vector.broadcast %cst_10 : f32 to vector<512x128xf32>
      %c0_11 = arith.constant 0 : index
      %c0_12 = arith.constant 0 : index
      %13 = vector.load %arg6[%c0_11, %c0_12] : memref<512x128xf32, #tpu.memory_space<vmem>>, vector<512x128xf32>
      tpu.vector_store %arg6[%c0_11, %c0_12], %12 {strides = array<i32>} : memref<512x128xf32, #tpu.memory_space<vmem>>, vector<512x128xf32>,
    } else {
    }
    %c0 = arith.constant 0 : index
    %c0_1 = arith.constant 0 : index
    %3 = vector.load %arg6[%c0, %c0_1] : memref<512x128xf32, #tpu.memory_space<vmem>>, vector<512x128xf32>
    %c0_2 = arith.constant 0 : index
    %c0_3 = arith.constant 0 : index
    %4 = vector.load %arg3[%c0_2, %c0_3] : memref<512x128xbf16, #tpu.memory_space<vmem>>, vector<512x128xbf16>
    %c0_4 = arith.constant 0 : index
    %c0_5 = arith.constant 0 : index
    %5 = vector.load %arg4[%c0_4, %c0_5] : memref<128x128xbf16, #tpu.memory_space<vmem>>, vector<128x128xbf16>
    %cst = arith.constant dense<0.000000e+00> : vector<512x128xf32>
    %6 = tpu.matmul %4, %5, %cst {dimension_numbers = #tpu.dot_dimension_numbers<[1], [0], [0], [1], [0, 0, 1, 1], [], []>} : vector<512x128xbf16>, vector<128x128xbf16>, vector<512x128xf32> -> vector<512x128xf32>
    %7 = arith.addf %3, %6 : vector<512x128xf32>
    %c0_6 = arith.constant 0 : index
    %c0_7 = arith.constant 0 : index
    %8 = vector.load %arg6[%c0_6, %c0_7] : memref<512x128xf32, #tpu.memory_space<vmem>>, vector<512x128xf32>
    tpu.vector_store %arg6[%c0_6, %c0_7], %7 {strides = array<i32>} : memref<512x128xf32, #tpu.memory_space<vmem>>, vector<512x128xf32>,
    %c0_i32_8 = arith.constant 0 : i32
    %9 = arith.cmpi eq, %arg2, %c0_i32_8 : i32
    %10 = arith.extui %9 : i1 to i32
    %c0_i32_9 = arith.constant 0 : i32
    %11 = arith.cmpi ne, %10, %c0_i32_9 : i32
    scf.if %11 {
      %c0_10 = arith.constant 0 : index
      %c0_11 = arith.constant 0 : index
      %12 = vector.load %arg6[%c0_10, %c0_11] : memref<512x128xf32, #tpu.memory_space<vmem>>, vector<512x128xf32>
      %13 = arith.truncf %12 : vector<512x128xf32> to vector<512x128xbf16>
      %c0_12 = arith.constant 0 : index
      %c0_13 = arith.constant 0 : index
      %14 = vector.load %arg5[%c0_12, %c0_13] : memref<512x128xbf16, #tpu.memory_space<vmem>>, vector<512x128xbf16>
      tpu.vector_store %arg5[%c0_12, %c0_13], %13 {strides = array<i32>} : memref<512x128xbf16, #tpu.memory_space<vmem>>, vector<512x128xbf16>,
    } else {
    }
    return
  }
  func.func @transform_0(%arg0: i32, %arg1: i32, %arg2: i32) -> (i32, i32) {
    %c0_i32 = arith.constant 0 : i32
    return %arg0, %arg2 : i32, i32
  }
  func.func @transform_1(%arg0: i32, %arg1: i32, %arg2: i32) -> (i32, i32) {
    %c0_i32 = arith.constant 0 : i32
    return %arg2, %arg1 : i32, i32
  }
  func.func @transform_2(%arg0: i32, %arg1: i32, %arg2: i32) -> (i32, i32) {
    %c0_i32 = arith.constant 0 : i32
    return %arg0, %arg1 : i32, i32
  }
}

</mosaic_0001>

<bundles_post_ra>
// kernel: tpu_custom_call.1
= control target key start
LH: loop header
LB: loop body
LE: loop exit
PB: predicated region body
PF: predicated region fallthrough
CT: control target
= control target key end

     0   :  { %7 = vsyncpa [#allocation4], 0  ;;  %s2163_s0 = inlined_call_operand.hbm [shape: bf16[512,128], index: 0, kind: input, shape index: {}]   ;;  %s2164_s1 = inlined_call_operand.hbm [shape: bf16[128,384], index: 1, kind: input, shape index: {}]   ;;  %s2165_s2 = inlined_call_operand.hbm [shape: bf16[512,384], index: 2, kind: output, shape index: {}]  }
   0x1   :  { %8 = vsyncpa [#allocation7], 0 }
   0x2   :  { %10 = vsyncpa [#allocation7 + $0x1], 0 }
   0x3   :  { %11 = vsyncpa [#allocation5], 0 }
   0x4   :  { %13 = vsyncpa [#allocation5 + $0x1], 0  ;;  %s1965_s9 = smov 0   ;;  %s1967_s10 = smov 0  }
   0x5   :  { %s1969_s11 = smov 0   ;;  %s1971_s12 = smov 0  }
   0x6   :  { %s1973_s13 = smov 0   ;;  %s1975_s14 = smov 0  }
   0x7 LB: > { %s1286_s15 = sadd.s32 4294967295, %s1941_s14   ;;  %s1287_s16 = sadd.s32 4294967294, %s1941_s14   ;;  %s1941_s14 = sphi %s1975_s14, %s19_s14   ;;  %s1937_s13 = sphi %s1973_s13, %s2179_s13   ;;  %s1933_s12 = sphi %s1971_s12, %s2178_s12   ;;  %s1929_s11 = sphi %s1969_s11, %s2177_s11   ;;  %s1925_s10 = sphi %s1967_s10, %s2176_s10   ;;  %s1921_s9 = sphi %s1965_s9, %s2175_s9  }
   0x8   : > { %p88_p0 = scmp.ne.s32.totalorder %s1925_s10, %s1921_s9  ;;  %p1999_p1 = scmp.eq.s32.totalorder %s1286_s15, 0 }
   0x9   : > { %p2003_p2 = scmp.eq.s32.totalorder %s1286_s15, 2  ;;  %p120_p3 = scmp.eq.s32.totalorder %s1287_s16, 2 }
   0xa   : > { %p2009_p4 = por %p1999_p1, %p88_p0  ;;  %p1288_p5 = scmp.ge.s32.totalorder %s1941_s14, 1 }
   0xb   : > { %p2014_p6 = por %p120_p3, %p88_p0  ;;  %p127_p7 = scmp.lt.s32.totalorder %s1941_s14, 4 }
   0xc   : > { %s142_s23 = sshll.u32 %s2163_s0, 4  ;;  %s1943_s25 = smov [#allocation3]   ;;  %s143_s23 = int_to_ptr.hbm [resolvable:$true] %s142_s23 }
   0xd   : > { %p2022_p8 = pnand %p1288_p5, %p127_p7  ;;  %s144_s26 = sshll.u32 %s1943_s25, 4  ;;  %s145_s26 = int_to_ptr.vmem [resolvable:$true] %s144_s26 }
   0xe   : > { %s2166_s27 = smov 64   ;;  %s1945_s28 = smov 4  }
   0xf   : > { %p1724_p9 = pneg %p2022_p8  ;;  %s34_s29 = sadd.s32 1, %s1937_s13 }
  0x10   : > { %p36_p11 = scmp.ge.s32.totalorder %s34_s29, 3  ;;  %s75_s30 = sadd.s32 1, %s1929_s11 }
  0x11   : > { %p1725_p10 = pnand %p1724_p9, %p1999_p1  ;;  %p82_p12 = scmp.ne.s32.totalorder %s1929_s11, %s1925_s10 }
  0x12   : > { %p83_p13 = scmp.eq.s32.totalorder %s1941_s14, 0  ;;  %s2181_s29 = smov (%p36_p11, %s34_s29), 0 }
  0x13   : > { %1727 = dma.hbm_to_vmem [thread:$0]  (!%p1725_p10), %s143_s23, 4096, %s145_s26, [#allocation4], %s2166_s27, %s2166_s27, %s1945_s28  }
  0x14   : > { %p2040_p0 = por %p83_p13, %p82_p12  ;;  %p2046_p3 = por %p2003_p2, %p82_p12 }
  0x15   : > { %s71_s5 = ssub.s32 %s1937_s13, %s2181_s29  ;;  %p1737_p5 = scmp.lt.s32.totalorder %s1941_s14, 3 }
  0x16   : > { %p73_p7 = scmp.eq.s32.totalorder %s71_s5, 0  ;;  %s158_s6 = sand.u32 1, %s1929_s11  }
  0x17   : > { %s1291_s7 = sshll.u32 %s158_s6, 6  ;;  %s1292_s15 = sshll.u32 %s1937_s13, 2 }
  0x18   : > { %s2055_s8 = scalar_select %p73_p7, %s1929_s11, %s75_s30  }
  0x19   : > { %s169_s22 = scalar_lea.hbm %s2164_s1, %s1292_s15  ;;  %s162_s23 = scalar_lea.vmem [#allocation6], %s1291_s7 }
  0x1a   : > { %s172_s25 = sshll.u32 %s162_s23, 4  ;;  %s170_s18 = sshll.u32 %s169_s22, 4  ;;  %s173_s25 = int_to_ptr.vmem [resolvable:$true] %s172_s25  ;;  %s171_s18 = int_to_ptr.hbm [resolvable:$true] %s170_s18 }
  0x1b   : > { %p1729_p2 = pnand %p1737_p5, %p2040_p0  ;;  %s159_s26 = scalar_lea.sflag [#allocation7], %s158_s6 }
  0x1c   : > { %s1946_s27 = smov 192   ;;  %s2174_s5 = smov 64  }
  0x1d   : > { %1731 = dma.hbm_to_vmem [thread:$0]  (!%p1729_p2), %s171_s18, 1024, %s173_s25, %s159_s26, %s1946_s27, %s2174_s5, %s1945_s28  }
  0x1e   : > { %184 = sbr.rel (%p2022_p8) target bundleno = 333 (0x14d), region = 28 }
  0x23   : > { %1908 = dma.done.wait (%p1999_p1), [#allocation4], 4096  }
  0x24   : > { %1910 = vsyncadd (%p1999_p1), [#allocation4], 4294963200  ;;  %s2072_s30 = sand.u32 1, %s1925_s10  }
  0x25   : > { %s1295_s3 = sshll.u32 %s2072_s30, 6  ;;  %s192_s6 = scalar_lea.sflag [#allocation7], %s2072_s30 }
  0x26   : > { %s2076_s7 = scalar_lea.vmem [#allocation6], %s1295_s3 }
  0x27   : > { %1912 = dma.done.wait (%p2009_p4), %s192_s6, 1024  }
  0x28   : > { %1914 = vsyncadd (%p2009_p4), %s192_s6, 4294966272  ;;  %v1500_v0 = vld [vmem:[%s2076_s7 + $0x38] sm:$0xff]  ;;  %v1499_v1 = vld [vmem:[%s2076_s7 + $0x30] sm:$0xff]  ;;  %s1296_s17 = sshll.u32 %s2072_s30, 8  ;;  %s1458_s24 = sshll.u32 %s1933_s12, 2 }
  0x29   : > { %672 = vmatpush.bf16.msra.mxu0 %v1500_v0  ;;  %1692 = vmatpush.bf16.msra.mxu1 %v1500_v0  ;;  %v1498_v2 = vld [vmem:[%s2076_s7 + $0x28] sm:$0xff]  ;;  %v1497_v3 = vld [vmem:[%s2076_s7 + $0x20] sm:$0xff]  ;;  %v1496_v4 = vld [vmem:[%s2076_s7 + $0x18] sm:$0xff]  ;;  %s2091_s19 = scalar_lea.vmem [#allocation8], %s1296_s17  ;;  %s1178_s15 = scalar_lea.hbm %s2165_s2, %s1458_s24 }
  0x2a   : > { %1693 = vmatpush.bf16.msra.mxu2 %v1500_v0  ;;  %1694 = vmatpush.bf16.msra.mxu3 %v1500_v0  ;;  %v1495_v5 = vld [vmem:[%s2076_s7 + $0x10] sm:$0xff]  ;;  %v1494_v6 = vld [vmem:[%s2076_s7 + $0x8] sm:$0xff]  ;;  %v1493_v7 = vld [vmem:[%s2076_s7] sm:$0xff]  ;;  %s1179_s16 = sshll.u32 %s2091_s19, 4  ;;  %s1181_s21 = sshll.u32 %s1178_s15, 4  ;;  %s1180_s16 = int_to_ptr.vmem [resolvable:$true] %s1179_s16  ;;  %s1182_s21 = int_to_ptr.hbm [resolvable:$true] %s1181_s21 }
  0x2b   : > { %v1461_v8 = vld [vmem:[#allocation3] sm:$0xff]  ;;  %v1462_v12 = vld [vmem:[#allocation3 + $0x8] sm:$0xff]  ;;  %v1463_v16 = vld [vmem:[#allocation3 + $0x10] sm:$0xff]  ;;  %s1165_s12 = scalar_lea.sflag [#allocation5], %s2072_s30  ;;  %s1869_s22 = sshra.s32 %s1182_s21, 4  ;;  %s1870_s22 = int_to_ptr.hbm [resolvable:$true] %s1869_s22 }
  0x2c   : > { %v1469_v9 = vld [vmem:[#allocation3 + $0x40] sm:$0xff]  ;;  %v1470_v13 = vld [vmem:[#allocation3 + $0x48] sm:$0xff]  ;;  %v1471_v17 = vld [vmem:[#allocation3 + $0x50] sm:$0xff]  ;;  %s1871_s23 = scalar_lea.hbm %s1870_s22, 256  ;;  %s1875_s26 = scalar_lea.hbm %s2165_s2, 768 }
  0x2d   : > { %673 = vmatpush.bf16.msra.mxu0 %v1499_v1  ;;  %1695 = vmatpush.bf16.msra.mxu1 %v1499_v1  ;;  %v1477_v10 = vld [vmem:[#allocation3 + $0x80] sm:$0xff]  ;;  %v1478_v14 = vld [vmem:[#allocation3 + $0x88] sm:$0xff]  ;;  %v1479_v18 = vld [vmem:[#allocation3 + $0x90] sm:$0xff]  ;;  %p1872_p1 = scmp.ne.s32.totalorder %s1870_s22, %s1871_s23  ;;  %p1876_p9 = scmp.lt.s32.totalorder %s1870_s22, %s2165_s2 }
  0x2e   : > { %1696 = vmatpush.bf16.msra.mxu2 %v1499_v1  ;;  %1697 = vmatpush.bf16.msra.mxu3 %v1499_v1  ;;  %v1485_v11 = vld [vmem:[#allocation3 + $0xc0] sm:$0xff]  ;;  %v1486_v15 = vld [vmem:[#allocation3 + $0xc8] sm:$0xff]  ;;  %v1487_v19 = vld [vmem:[#allocation3 + $0xd0] sm:$0xff]  ;;  %p1877_p10 = scmp.lt.s32.totalorder %s1875_s26, %s1871_s23 }
  0x2f   : > { %v1464_v20 = vld [vmem:[#allocation3 + $0x18] sm:$0xff]  ;;  %v1465_v24 = vld [vmem:[#allocation3 + $0x20] sm:$0xff]  ;;  %v1466_v28 = vld [vmem:[#allocation3 + $0x28] sm:$0xff]  ;;  %p1873_p4 = pnand %p1872_p1, %p2046_p3 }
  0x30   : > { %v1472_v21 = vld [vmem:[#allocation3 + $0x58] sm:$0xff]  ;;  %v1473_v25 = vld [vmem:[#allocation3 + $0x60] sm:$0xff]  ;;  %v1474_v29 = vld [vmem:[#allocation3 + $0x68] sm:$0xff]  ;;  %p1878_p11 = por %p1877_p10, %p1876_p9 }
  0x31   : > { %674 = vmatpush.bf16.msra.mxu0 %v1498_v2  ;;  %1698 = vmatpush.bf16.msra.mxu1 %v1498_v2  ;;  %v1480_v22 = vld [vmem:[#allocation3 + $0x98] sm:$0xff]  ;;  %v1481_v26 = vld [vmem:[#allocation3 + $0xa0] sm:$0xff]  ;;  %v1482_v30 = vld [vmem:[#allocation3 + $0xa8] sm:$0xff]  ;;  %p1874_p8 = pneg %p1873_p4 }
  0x32   : > { %1699 = vmatpush.bf16.msra.mxu2 %v1498_v2  ;;  %1700 = vmatpush.bf16.msra.mxu3 %v1498_v2  ;;  %v1488_v23 = vld [vmem:[#allocation3 + $0xd8] sm:$0xff]  ;;  %v1489_v27 = vld [vmem:[#allocation3 + $0xe0] sm:$0xff]  ;;  %v1490_v31 = vld [vmem:[#allocation3 + $0xe8] sm:$0xff] }
  0x33   : > { %v1467_v32 = vld [vmem:[#allocation3 + $0x30] sm:$0xff]  ;;  %v1468_v36 = vld [vmem:[#allocation3 + $0x38] sm:$0xff]  ;;  %p1879_p12 = pnand %p1878_p11, %p1874_p8 }
  0x34   : > { %v1475_v33 = vld [vmem:[#allocation3 + $0x70] sm:$0xff]  ;;  %v1476_v37 = vld [vmem:[#allocation3 + $0x78] sm:$0xff] }
  0x35   : > { %675 = vmatpush.bf16.msra.mxu0 %v1497_v3  ;;  %1701 = vmatpush.bf16.msra.mxu1 %v1497_v3  ;;  %v1483_v34 = vld [vmem:[#allocation3 + $0xb0] sm:$0xff]  ;;  %v1484_v38 = vld [vmem:[#allocation3 + $0xb8] sm:$0xff] }
  0x36   : > { %1702 = vmatpush.bf16.msra.mxu2 %v1497_v3  ;;  %1703 = vmatpush.bf16.msra.mxu3 %v1497_v3  ;;  %v1491_v35 = vld [vmem:[#allocation3 + $0xf0] sm:$0xff]  ;;  %v1492_v39 = vld [vmem:[#allocation3 + $0xf8] sm:$0xff] }
  0x39   : > { %676 = vmatpush.bf16.msra.mxu0 %v1496_v4  ;;  %1704 = vmatpush.bf16.msra.mxu1 %v1496_v4 }
  0x3a   : > { %1705 = vmatpush.bf16.msra.mxu2 %v1496_v4  ;;  %1706 = vmatpush.bf16.msra.mxu3 %v1496_v4 }
  0x3d   : > { %677 = vmatpush.bf16.msra.mxu0 %v1495_v5  ;;  %1707 = vmatpush.bf16.msra.mxu1 %v1495_v5 }
  0x3e   : > { %1708 = vmatpush.bf16.msra.mxu2 %v1495_v5  ;;  %1709 = vmatpush.bf16.msra.mxu3 %v1495_v5 }
  0x41   : > { %678 = vmatpush.bf16.msra.mxu0 %v1494_v6  ;;  %1710 = vmatpush.bf16.msra.mxu1 %v1494_v6 }
  0x42   : > { %1711 = vmatpush.bf16.msra.mxu2 %v1494_v6  ;;  %1712 = vmatpush.bf16.msra.mxu3 %v1494_v6 }
  0x45   : > { %679 = vmatpush.bf16.msra.mxu0 %v1493_v7  ;;  %1713 = vmatpush.bf16.msra.mxu1 %v1493_v7 }
  0x46   : > { %1714 = vmatpush.bf16.msra.mxu2 %v1493_v7  ;;  %1715 = vmatpush.bf16.msra.mxu3 %v1493_v7 }
  0x48   : > { %680 = vmatmul.bf16.vlgmr.msra.gmra.mxu0 %v1461_v8  ;;  %720 = vmatmul.bf16.vlgmr.msra.gmra.mxu1 %v1469_v9 }
  0x49   : > { %760 = vmatmul.bf16.vlgmr.msra.gmra.mxu2 %v1477_v10  ;;  %800 = vmatmul.bf16.vlgmr.msra.gmra.mxu3 %v1485_v11 }
  0x58   : > { %685 = vmatmul.bf16.gmra.mxu0 %v1462_v12  ;;  %725 = vmatmul.bf16.gmra.mxu1 %v1470_v13 }
  0x59   : > { %765 = vmatmul.bf16.gmra.mxu2 %v1478_v14  ;;  %805 = vmatmul.bf16.gmra.mxu3 %v1486_v15 }
  0x68   : > { %690 = vmatmul.bf16.gmra.mxu0 %v1463_v16  ;;  %730 = vmatmul.bf16.gmra.mxu1 %v1471_v17 }
  0x69   : > { %770 = vmatmul.bf16.gmra.mxu2 %v1479_v18  ;;  %810 = vmatmul.bf16.gmra.mxu3 %v1487_v19 }
  0x78   : > { %695 = vmatmul.bf16.gmra.mxu0 %v1464_v20  ;;  %735 = vmatmul.bf16.gmra.mxu1 %v1472_v21 }
  0x79   : > { %775 = vmatmul.bf16.gmra.mxu2 %v1480_v22  ;;  %815 = vmatmul.bf16.gmra.mxu3 %v1488_v23 }
  0x88   : > { %700 = vmatmul.bf16.gmra.mxu0 %v1465_v24  ;;  %740 = vmatmul.bf16.gmra.mxu1 %v1473_v25 }
  0x89   : > { %780 = vmatmul.bf16.gmra.mxu2 %v1481_v26  ;;  %820 = vmatmul.bf16.gmra.mxu3 %v1489_v27 }
  0x98   : > { %705 = vmatmul.bf16.gmra.mxu0 %v1466_v28  ;;  %745 = vmatmul.bf16.gmra.mxu1 %v1474_v29 }
  0x99   : > { %785 = vmatmul.bf16.gmra.mxu2 %v1482_v30  ;;  %825 = vmatmul.bf16.gmra.mxu3 %v1490_v31 }
  0xa8   : > { %710 = vmatmul.bf16.gmra.mxu0 %v1467_v32  ;;  %750 = vmatmul.bf16.gmra.mxu1 %v1475_v33 }
  0xa9   : > { %790 = vmatmul.bf16.gmra.mxu2 %v1483_v34  ;;  %830 = vmatmul.bf16.gmra.mxu3 %v1491_v35 }
  0xb8   : > { %715 = vmatmul.bf16.gmra.mxu0 %v1468_v36  ;;  %755 = vmatmul.bf16.gmra.mxu1 %v1476_v37 }
  0xb9   : > { %795 = vmatmul.bf16.gmra.mxu2 %v1484_v38  ;;  %835 = vmatmul.bf16.gmra.mxu3 %v1492_v39 }
  0xc5   : > { %v681_v40 = vpop.f32.mrf.mxu0  ;;  %v721_v41 = vpop.f32.mrf.mxu1 }
  0xcc   : > { %v761_v42 = vpop.f32.mrf.mxu2  ;;  %v801_v43 = vpop.f32.mrf.mxu3 }
  0xcd   : > { %v683_v44 = vpop.f32.mrf.mxu0  ;;  %v723_v45 = vpop.f32.mrf.mxu1 }
  0xce   : > { %v1504_v46 = vpack.c.bf16 %v683_v44, %v681_v40  ;;  %v1544_v47 = vpack.c.bf16 %v723_v45, %v721_v41 }
  0xd0   : > { %1505 = vst [vmem:[%s2091_s19] sm:$0xff] %v1504_v46  }
  0xd1   : > { %1668 = vst [vmem:[%s2091_s19 + $0x40] sm:$0xff] %v1544_v47  }
  0xd4   : > { %v763_v48 = vpop.f32.mrf.mxu2  ;;  %v803_v49 = vpop.f32.mrf.mxu3 }
  0xd5   : > { %v1584_v50 = vpack.c.bf16 %v763_v48, %v761_v42  ;;  %v1624_v51 = vpack.c.bf16 %v803_v49, %v801_v43  ;;  %v686_v52 = vpop.f32.mrf.mxu0  ;;  %v726_v53 = vpop.f32.mrf.mxu1 }
  0xd7   : > { %1676 = vst [vmem:[%s2091_s19 + $0x80] sm:$0xff] %v1584_v50  }
  0xd8   : > { %1684 = vst [vmem:[%s2091_s19 + $0xc0] sm:$0xff] %v1624_v51  }
  0xdc   : > { %v766_v54 = vpop.f32.mrf.mxu2  ;;  %v806_v55 = vpop.f32.mrf.mxu3 }
  0xdd   : > { %v688_v56 = vpop.f32.mrf.mxu0  ;;  %v728_v57 = vpop.f32.mrf.mxu1 }
  0xde   : > { %v1509_v58 = vpack.c.bf16 %v688_v56, %v686_v52  ;;  %v1549_v59 = vpack.c.bf16 %v728_v57, %v726_v53 }
  0xe0   : > { %1661 = vst [vmem:[%s2091_s19 + $0x8] sm:$0xff] %v1509_v58  }
  0xe1   : > { %1669 = vst [vmem:[%s2091_s19 + $0x48] sm:$0xff] %v1549_v59  }
  0xe4   : > { %v768_v60 = vpop.f32.mrf.mxu2  ;;  %v808_v61 = vpop.f32.mrf.mxu3 }
  0xe5   : > { %v1589_v62 = vpack.c.bf16 %v768_v60, %v766_v54  ;;  %v1629_v63 = vpack.c.bf16 %v808_v61, %v806_v55  ;;  %v691_v0 = vpop.f32.mrf.mxu0  ;;  %v731_v1 = vpop.f32.mrf.mxu1 }
  0xe7   : > { %1677 = vst [vmem:[%s2091_s19 + $0x88] sm:$0xff] %v1589_v62  }
  0xe8   : > { %1685 = vst [vmem:[%s2091_s19 + $0xc8] sm:$0xff] %v1629_v63  }
  0xec   : > { %v771_v2 = vpop.f32.mrf.mxu2  ;;  %v811_v3 = vpop.f32.mrf.mxu3 }
  0xed   : > { %v693_v4 = vpop.f32.mrf.mxu0  ;;  %v733_v5 = vpop.f32.mrf.mxu1 }
  0xee   : > { %v1514_v6 = vpack.c.bf16 %v693_v4, %v691_v0  ;;  %v1554_v7 = vpack.c.bf16 %v733_v5, %v731_v1 }
  0xf0   : > { %1662 = vst [vmem:[%s2091_s19 + $0x10] sm:$0xff] %v1514_v6  }
  0xf1   : > { %1670 = vst [vmem:[%s2091_s19 + $0x50] sm:$0xff] %v1554_v7  }
  0xf4   : > { %v773_v8 = vpop.f32.mrf.mxu2  ;;  %v813_v9 = vpop.f32.mrf.mxu3 }
  0xf5   : > { %v1594_v10 = vpack.c.bf16 %v773_v8, %v771_v2  ;;  %v1634_v11 = vpack.c.bf16 %v813_v9, %v811_v3  ;;  %v696_v12 = vpop.f32.mrf.mxu0  ;;  %v736_v13 = vpop.f32.mrf.mxu1 }
  0xf7   : > { %1678 = vst [vmem:[%s2091_s19 + $0x90] sm:$0xff] %v1594_v10  }
  0xf8   : > { %1686 = vst [vmem:[%s2091_s19 + $0xd0] sm:$0xff] %v1634_v11  }
  0xfc   : > { %v776_v14 = vpop.f32.mrf.mxu2  ;;  %v816_v15 = vpop.f32.mrf.mxu3 }
  0xfd   : > { %v698_v16 = vpop.f32.mrf.mxu0  ;;  %v738_v17 = vpop.f32.mrf.mxu1 }
  0xfe   : > { %v1519_v18 = vpack.c.bf16 %v698_v16, %v696_v12  ;;  %v1559_v19 = vpack.c.bf16 %v738_v17, %v736_v13 }
 0x100   : > { %1663 = vst [vmem:[%s2091_s19 + $0x18] sm:$0xff] %v1519_v18  }
 0x101   : > { %1671 = vst [vmem:[%s2091_s19 + $0x58] sm:$0xff] %v1559_v19  }
 0x104   : > { %v778_v20 = vpop.f32.mrf.mxu2  ;;  %v818_v21 = vpop.f32.mrf.mxu3 }
 0x105   : > { %v1599_v22 = vpack.c.bf16 %v778_v20, %v776_v14  ;;  %v1639_v23 = vpack.c.bf16 %v818_v21, %v816_v15  ;;  %v701_v24 = vpop.f32.mrf.mxu0  ;;  %v741_v25 = vpop.f32.mrf.mxu1 }
 0x107   : > { %1679 = vst [vmem:[%s2091_s19 + $0x98] sm:$0xff] %v1599_v22  }
 0x108   : > { %1687 = vst [vmem:[%s2091_s19 + $0xd8] sm:$0xff] %v1639_v23  }
 0x10c   : > { %v781_v26 = vpop.f32.mrf.mxu2  ;;  %v821_v27 = vpop.f32.mrf.mxu3 }
 0x10d   : > { %v703_v28 = vpop.f32.mrf.mxu0  ;;  %v743_v29 = vpop.f32.mrf.mxu1 }
 0x10e   : > { %v1524_v30 = vpack.c.bf16 %v703_v28, %v701_v24  ;;  %v1564_v31 = vpack.c.bf16 %v743_v29, %v741_v25 }
 0x110   : > { %1664 = vst [vmem:[%s2091_s19 + $0x20] sm:$0xff] %v1524_v30  }
 0x111   : > { %1672 = vst [vmem:[%s2091_s19 + $0x60] sm:$0xff] %v1564_v31  }
 0x114   : > { %v783_v32 = vpop.f32.mrf.mxu2  ;;  %v823_v33 = vpop.f32.mrf.mxu3 }
 0x115   : > { %v1604_v34 = vpack.c.bf16 %v783_v32, %v781_v26  ;;  %v1644_v35 = vpack.c.bf16 %v823_v33, %v821_v27  ;;  %v706_v36 = vpop.f32.mrf.mxu0  ;;  %v746_v37 = vpop.f32.mrf.mxu1 }
 0x117   : > { %1680 = vst [vmem:[%s2091_s19 + $0xa0] sm:$0xff] %v1604_v34  }
 0x118   : > { %1688 = vst [vmem:[%s2091_s19 + $0xe0] sm:$0xff] %v1644_v35  }
 0x11c   : > { %v786_v38 = vpop.f32.mrf.mxu2  ;;  %v826_v39 = vpop.f32.mrf.mxu3 }
 0x11d   : > { %v708_v40 = vpop.f32.mrf.mxu0  ;;  %v748_v41 = vpop.f32.mrf.mxu1 }
 0x11e   : > { %v1529_v42 = vpack.c.bf16 %v708_v40, %v706_v36  ;;  %v1569_v43 = vpack.c.bf16 %v748_v41, %v746_v37 }
 0x120   : > { %1665 = vst [vmem:[%s2091_s19 + $0x28] sm:$0xff] %v1529_v42  }
 0x121   : > { %1673 = vst [vmem:[%s2091_s19 + $0x68] sm:$0xff] %v1569_v43  }
 0x124   : > { %v788_v44 = vpop.f32.mrf.mxu2  ;;  %v828_v45 = vpop.f32.mrf.mxu3 }
 0x125   : > { %v1609_v46 = vpack.c.bf16 %v788_v44, %v786_v38  ;;  %v1649_v47 = vpack.c.bf16 %v828_v45, %v826_v39  ;;  %v711_v48 = vpop.f32.mrf.mxu0  ;;  %v751_v49 = vpop.f32.mrf.mxu1 }
 0x127   : > { %1681 = vst [vmem:[%s2091_s19 + $0xa8] sm:$0xff] %v1609_v46  }
 0x128   : > { %1689 = vst [vmem:[%s2091_s19 + $0xe8] sm:$0xff] %v1649_v47  }
 0x12c   : > { %v791_v50 = vpop.f32.mrf.mxu2  ;;  %v831_v51 = vpop.f32.mrf.mxu3 }
 0x12d   : > { %v713_v52 = vpop.f32.mrf.mxu0  ;;  %v753_v53 = vpop.f32.mrf.mxu1 }
 0x12e   : > { %v1534_v54 = vpack.c.bf16 %v713_v52, %v711_v48  ;;  %v1574_v55 = vpack.c.bf16 %v753_v53, %v751_v49 }
 0x130   : > { %1666 = vst [vmem:[%s2091_s19 + $0x30] sm:$0xff] %v1534_v54  }
 0x131   : > { %1674 = vst [vmem:[%s2091_s19 + $0x70] sm:$0xff] %v1574_v55  }
 0x134   : > { %v793_v56 = vpop.f32.mrf.mxu2  ;;  %v833_v57 = vpop.f32.mrf.mxu3 }
 0x135   : > { %v1614_v58 = vpack.c.bf16 %v793_v56, %v791_v50  ;;  %v1654_v59 = vpack.c.bf16 %v833_v57, %v831_v51  ;;  %v716_v60 = vpop.f32.mrf.mxu0  ;;  %v756_v61 = vpop.f32.mrf.mxu1 }
 0x137   : > { %1682 = vst [vmem:[%s2091_s19 + $0xb0] sm:$0xff] %v1614_v58  }
 0x138   : > { %1690 = vst [vmem:[%s2091_s19 + $0xf0] sm:$0xff] %v1654_v59  }
 0x13c   : > { %v796_v62 = vpop.f32.mrf.mxu2  ;;  %v836_v63 = vpop.f32.mrf.mxu3 }
 0x13d   : > { %v718_v0 = vpop.f32.mrf.mxu0  ;;  %v758_v1 = vpop.f32.mrf.mxu1 }
 0x13e   : > { %v1539_v2 = vpack.c.bf16 %v718_v0, %v716_v60  ;;  %v1579_v3 = vpack.c.bf16 %v758_v1, %v756_v61 }
 0x140   : > { %1667 = vst [vmem:[%s2091_s19 + $0x38] sm:$0xff] %v1539_v2  }
 0x141   : > { %1675 = vst [vmem:[%s2091_s19 + $0x78] sm:$0xff] %v1579_v3  }
 0x144   : > { %v798_v4 = vpop.f32.mrf.mxu2  ;;  %v838_v5 = vpop.f32.mrf.mxu3 }
 0x145   : > { %v1619_v6 = vpack.c.bf16 %v798_v4, %v796_v62  ;;  %v1659_v7 = vpack.c.bf16 %v838_v5, %v836_v63 }
 0x147   : > { %1683 = vst [vmem:[%s2091_s19 + $0xb8] sm:$0xff] %v1619_v6  }
 0x148   : > { %1691 = vst [vmem:[%s2091_s19 + $0xf8] sm:$0xff] %v1659_v7  }
 0x149   : > { %1882 = shalt.err (!%p1879_p12)
}
 0x14a   : > { %s1947_s30 = smov 64   ;;  %s1948_s6 = smov 192  }
 0x14b   : > { %s1949_s7 = smov 4  }
 0x14c   : > { %1722 = dma.vmem_to_hbm [thread:$0]  (%p2046_p3), %s1180_s16, 4096, %s1182_s21, %s1165_s12, %s1947_s30, %s1948_s6, %s1949_s7  }
 0x14d PF: > { %p1739_p13 = scmp.ge.s32.totalorder %s1941_s14, 2  ;;  %s1196_s17 = sand.u32 1, %s1921_s9  }
 0x14e   : > { %s1197_s19 = scalar_lea.sflag [#allocation5], %s1196_s17 }
 0x14f   : > { %p1733_p0 = pnand %p1739_p13, %p2014_p6 }
 0x151   : > { %p1734_p5 = pneg %p1733_p0 }
 0x153   : > { %1916 = dma.done.wait (%p1734_p5), %s1197_s19, 4096  }
 0x154   : > { %1918 = vsyncadd (%p1734_p5), %s1197_s19, 4294963200  ;;  %s19_s14 = sadd.s32 1, %s1941_s14   ;;  %s2175_s9 = smov %s1925_s10 }
 0x155   : > { %p16_p7 = scmp.ge.s32.totalorder %s19_s14, 5   ;;  %s2176_s10 = smov %s1929_s11 }
 0x156   : > { %s2177_s11 = smov %s2055_s8  ;;  %s2178_s12 = smov %s1937_s13 }
 0x157   : > { %s2179_s13 = smov %s2181_s29  ;;  %18 = sbr.rel (!%p16_p7) target bundleno = 7 (0x7), region = 87 }
 0x15c   :  { %1203 = vsyncpa [#allocation4], 1 }
 0x15d   :  { %1205 = vsyncpa [#allocation4 + $0x1], 1 }
 0x15e   :  { %1206 = vsyncpa [#allocation7], 1 }
 0x15f   :  { %1208 = vsyncpa [#allocation7 + $0x1], 1 }
 0x160   :  { %1209 = vsyncpa [#allocation5], 1 }
 0x161   :  { %1211 = vsyncpa [#allocation5 + $0x1], 1 }

</bundles_post_ra>
